<compile_context>
chip_gen: v5e
topology: v5e:2x2
jax: 0.10.0
libtpu: 0.0.40
codegen_flags: <defaults>
</compile_context>

<pallas_src>
import jax
import jax.numpy as jnp
from jax import lax
from jax.experimental import pallas as pl
from jax.experimental.pallas import tpu as pltpu


_LANE = 128
_MAX_BATCH_TILE = 16384        # ~9 MB peak VMEM at f32; amortizes grid-step overhead
_SMALL_BATCH_THRESHOLD = 256   # below this, plain XLA beats kernel launch overhead


def value_network_kernel(x_ref,
                         w_in_ref, b_in_ref,
                         w0_ref, b0_ref,
                         w1_ref, b1_ref,
                         w_out_ref, b_out_ref,
                         out_ref):
    """Fused MLP forward for one batch tile.

    x_ref is a (batch_tile, state_dim) block of the original (B, state_dim)
    input — no HBM-side transpose.  The first dot contracts the shared
    state_dim axis of W (out, in) and x (bt, in); the implied relayout happens
    in-kernel on the XLU.  Activations are (features, batch_tile) so the
    (1, batch_tile) output block is written with lane-dense, unmasked stores.
    """
    x = x_ref[...]                                              # (bt, state_dim)

    # input layer + ReLU: contract W axis 1 (in) with x axis 1 (state_dim)
    q = lax.dot_general(w_in_ref[...], x,
                        dimension_numbers=(((1,), (1,)), ((), ())),
                        preferred_element_type=jnp.float32)     # (h0, bt)
    q = jnp.maximum(q + b_in_ref[...], 0.0)

    # hidden layers (config.layer_info) + ReLU
    q = jnp.dot(w0_ref[...], q, preferred_element_type=jnp.float32)
    q = jnp.maximum(q + b0_ref[...], 0.0)

    q = jnp.dot(w1_ref[...], q, preferred_element_type=jnp.float32)
    q = jnp.maximum(q + b1_ref[...], 0.0)

    # output layer (no activation)
    v = jnp.dot(w_out_ref[...], q, preferred_element_type=jnp.float32)
    out_ref[...] = (v + b_out_ref[...]).astype(out_ref.dtype)   # (1, bt) lane-dense


def _round_up(x, m):
    return ((x + m - 1) // m) * m


def _choose_batch_tile(b_pad):
    """b_pad is a multiple of 128.  Pick the largest 128-multiple tile that
    (a) divides b_pad, (b) is <= _MAX_BATCH_TILE, and (c) leaves >= 2 grid
    steps whenever b_pad >= 256 (keeps both v7x TensorCores busy under
    dimension_semantics=('parallel',) and gives the pipeline overlap)."""
    tile = min(b_pad, _MAX_BATCH_TILE)
    if b_pad >= 2 * _LANE:
        tile = min(tile, b_pad // 2)
    tile = max(_LANE, (tile // _LANE) * _LANE)
    while b_pad % tile != 0:          # terminates: b_pad % 128 == 0
        tile -= _LANE
    return tile


def _pallas_forward(state, params):
    B, state_dim = state.shape

    # Pad the batch up to a 128 multiple (keeps output stores lane-dense and
    # avoids an unbounded single-block VMEM request); slice the result back.
    B_pad = _round_up(B, _LANE)
    if B_pad != B:
        state = jnp.pad(state, ((0, B_pad - B), (0, 0)))

    batch_tile = _choose_batch_tile(B_pad)
    grid = (B_pad // batch_tile,)

    # Weights/biases: full-array blocks, same block every step -> VMEM-resident
    # across the grid (~10 KB total).
    def full_spec(shape):
        return pl.BlockSpec(shape, lambda i: (0, 0))

    in_specs = [
        pl.BlockSpec((batch_tile, state_dim), lambda i: (i, 0)),   # x tile, no transpose
        full_spec(params["w_in"].shape), full_spec(params["b_in"].shape),
        full_spec(params["w0"].shape),   full_spec(params["b0"].shape),
        full_spec(params["w1"].shape),   full_spec(params["b1"].shape),
        full_spec(params["w_out"].shape), full_spec(params["b_out"].shape),
    ]
    out_spec = pl.BlockSpec((1, batch_tile), lambda i: (0, i))     # lane-dense

    out_t = pl.pallas_call(
        value_network_kernel,
        out_shape=jax.ShapeDtypeStruct((1, B_pad), jnp.float32),
        grid_spec=pltpu.PrefetchScalarGridSpec(
            num_scalar_prefetch=0,
            grid=grid,
            in_specs=in_specs,
            out_specs=out_spec,
        ),
        compiler_params=pltpu.CompilerParams(
            dimension_semantics=("parallel",),
            vmem_limit_bytes=32 * 1024 * 1024),
    )(state,
      params["w_in"], params["b_in"],
      params["w0"], params["b0"],
      params["w1"], params["b1"],
      params["w_out"], params["b_out"])

    return out_t[0, :B, None]                                      # (B, 1)


def reference_forward(state, params):
    """Plain-JAX reference (and small-batch fast path) matching the PyTorch
    forward.  HIGHEST precision so the f32-accumulating kernel compares tight."""
    hp = lax.Precision.HIGHEST
    q = jnp.maximum(jnp.dot(state, params["w_in"].T, precision=hp) + params["b_in"].T, 0.0)
    q = jnp.maximum(jnp.dot(q, params["w0"].T, precision=hp) + params["b0"].T, 0.0)
    q = jnp.maximum(jnp.dot(q, params["w1"].T, precision=hp) + params["b1"].T, 0.0)
    return jnp.dot(q, params["w_out"].T, precision=hp) + params["b_out"].T


@jax.jit
def value_network_forward(state, params):
    """state: (B, state_dim) f32.  params: (out, in) weights, (out, 1) biases.
    Returns (B, 1) values."""
    B = state.shape[0]
    if B < _SMALL_BATCH_THRESHOLD:
        # Launch/DMA overhead dwarfs the few-KFLOP-per-row compute; let XLA fuse it.
        return reference_forward(state, params)
    return _pallas_forward(state, params)


def init_params(key, state_dim, layer_info, init_w):
    """Deterministic init mirroring nn.Linear defaults (U(-1/sqrt(fan_in), ..))
    and the output layer's explicit U(-init_w, init_w) init.
    Weights stored as (out, in) [PyTorch orientation], biases as (out, 1)."""
    def linear(key, n_in, n_out, bound=None):
        kw, kb = jax.random.split(key)
        if bound is None:
            bound = 1.0 / jnp.sqrt(n_in)
        w = jax.random.uniform(kw, (n_out, n_in), jnp.float32, -bound, bound)
        b = jax.random.uniform(kb, (n_out, 1), jnp.float32, -bound, bound)
        return w, b

    k_in, k0, k1, k_out = jax.random.split(key, 4)
    w_in, b_in = linear(k_in, state_dim, layer_info[0][0])
    w0, b0 = linear(k0, layer_info[0][0], layer_info[0][1])
    w1, b1 = linear(k1, layer_info[1][0], layer_info[1][1])
    w_out, b_out = linear(k_out, layer_info[-1][1], 1, bound=init_w)
    return dict(w_in=w_in, b_in=b_in, w0=w0, b0=b0, w1=w1, b1=b1,
                w_out=w_out, b_out=b_out)


if __name__ == "__main__":
    # Shapes consistent with the module: state_dim=16,
    # config.layer_info=[(32, 32), (32, 32)], config.init_w=3e-3.
    state_dim = 16
    layer_info = [(32, 32), (32, 32)]
    init_w = 3e-3

    key = jax.random.PRNGKey(0)
    k_state, k_state2, k_params = jax.random.split(key, 3)
    params = init_params(k_params, state_dim, layer_info, init_w)

    # Kernel path: B=256 -> batch_tile=128, 2 grid steps (both v7x TCs busy).
    state = jax.random.normal(k_state, (256, state_dim), jnp.float32)
    out = jax.block_until_ready(value_network_forward(state, params))
    ref = reference_forward(state, params)
    assert out.shape == (256, 1), out.shape
    assert jnp.allclose(out, ref, atol=1e-5, rtol=1e-4), "mismatch vs reference (B=256)"

    # Non-128-multiple batch exercises the padding path (pads 300 -> 384, 3 steps).
    state2 = jax.random.normal(k_state2, (300, state_dim), jnp.float32)
    out2 = jax.block_until_ready(value_network_forward(state2, params))
    ref2 = reference_forward(state2, params)
    assert out2.shape == (300, 1), out2.shape
    assert jnp.allclose(out2, ref2, atol=1e-5, rtol=1e-4), "mismatch vs reference (B=300)"

    print("KERNEL_OK")
</pallas_src>

<mosaic_0001>
module attributes {stable_mosaic.version = 11 : i64} {
  func.func @value_network_kernel(%arg0: i32, %arg1: memref<128x16xf32, #tpu.memory_space<vmem>>, %arg2: memref<32x16xf32, #tpu.memory_space<vmem>>, %arg3: memref<32x1xf32, #tpu.memory_space<vmem>>, %arg4: memref<32x32xf32, #tpu.memory_space<vmem>>, %arg5: memref<32x1xf32, #tpu.memory_space<vmem>>, %arg6: memref<32x32xf32, #tpu.memory_space<vmem>>, %arg7: memref<32x1xf32, #tpu.memory_space<vmem>>, %arg8: memref<1x32xf32, #tpu.memory_space<vmem>>, %arg9: memref<1x1xf32, #tpu.memory_space<vmem>>, %arg10: memref<1x128xf32, #tpu.memory_space<vmem>>) attributes {dimension_semantics = [#tpu.dimension_semantics<parallel>], iteration_bounds = array<i64: 2>, scalar_prefetch = 0 : i64, scratch_operands = 0 : i64, tpu.core_type = #tpu.core_type<tc>, window_params = [{transform_indices = @transform_0, window_bounds = array<i64: 128, 16>}, {pipeline_mode = #tpu.pipeline_mode<synchronous>, transform_indices = @transform_1, window_bounds = array<i64: 32, 16>}, {pipeline_mode = #tpu.pipeline_mode<synchronous>, transform_indices = @transform_2, window_bounds = array<i64: 32, 1>}, {pipeline_mode = #tpu.pipeline_mode<synchronous>, transform_indices = @transform_3, window_bounds = array<i64: 32, 32>}, {pipeline_mode = #tpu.pipeline_mode<synchronous>, transform_indices = @transform_4, window_bounds = array<i64: 32, 1>}, {pipeline_mode = #tpu.pipeline_mode<synchronous>, transform_indices = @transform_5, window_bounds = array<i64: 32, 32>}, {pipeline_mode = #tpu.pipeline_mode<synchronous>, transform_indices = @transform_6, window_bounds = array<i64: 32, 1>}, {pipeline_mode = #tpu.pipeline_mode<synchronous>, transform_indices = @transform_7, window_bounds = array<i64: 1, 32>}, {pipeline_mode = #tpu.pipeline_mode<synchronous>, transform_indices = @transform_8, window_bounds = array<i64: 1, 1>}, {transform_indices = @transform_9, window_bounds = array<i64: 1, 128>}]} {
    %c0 = arith.constant 0 : index
    %c0_0 = arith.constant 0 : index
    %0 = vector.load %arg1[%c0, %c0_0] : memref<128x16xf32, #tpu.memory_space<vmem>>, vector<128x16xf32>
    %c0_1 = arith.constant 0 : index
    %c0_2 = arith.constant 0 : index
    %1 = vector.load %arg2[%c0_1, %c0_2] : memref<32x16xf32, #tpu.memory_space<vmem>>, vector<32x16xf32>
    %cst = arith.constant dense<0.000000e+00> : vector<32x128xf32>
    %2 = tpu.matmul %1, %0, %cst {dimension_numbers = #tpu.dot_dimension_numbers<[1], [1], [0], [0], [0, 0, 1, 0], [], []>} : vector<32x16xf32>, vector<128x16xf32>, vector<32x128xf32> -> vector<32x128xf32>
    %c0_3 = arith.constant 0 : index
    %c0_4 = arith.constant 0 : index
    %3 = vector.load %arg3[%c0_3, %c0_4] : memref<32x1xf32, #tpu.memory_space<vmem>>, vector<32x1xf32>
    %4 = vector.broadcast %3 : vector<32x1xf32> to vector<32x128xf32>
    %5 = arith.addf %2, %4 : vector<32x128xf32>
    %cst_5 = arith.constant 0.000000e+00 : f32
    %6 = vector.broadcast %cst_5 : f32 to vector<32x128xf32>
    %7 = arith.maximumf %5, %6 : vector<32x128xf32>
    %c0_6 = arith.constant 0 : index
    %c0_7 = arith.constant 0 : index
    %8 = vector.load %arg4[%c0_6, %c0_7] : memref<32x32xf32, #tpu.memory_space<vmem>>, vector<32x32xf32>
    %cst_8 = arith.constant dense<0.000000e+00> : vector<32x128xf32>
    %9 = tpu.matmul %8, %7, %cst_8 {dimension_numbers = #tpu.dot_dimension_numbers<[1], [0], [0], [1], [0, 0, 1, 1], [], []>} : vector<32x32xf32>, vector<32x128xf32>, vector<32x128xf32> -> vector<32x128xf32>
    %c0_9 = arith.constant 0 : index
    %c0_10 = arith.constant 0 : index
    %10 = vector.load %arg5[%c0_9, %c0_10] : memref<32x1xf32, #tpu.memory_space<vmem>>, vector<32x1xf32>
    %11 = vector.broadcast %10 : vector<32x1xf32> to vector<32x128xf32>
    %12 = arith.addf %9, %11 : vector<32x128xf32>
    %cst_11 = arith.constant 0.000000e+00 : f32
    %13 = vector.broadcast %cst_11 : f32 to vector<32x128xf32>
    %14 = arith.maximumf %12, %13 : vector<32x128xf32>
    %c0_12 = arith.constant 0 : index
    %c0_13 = arith.constant 0 : index
    %15 = vector.load %arg6[%c0_12, %c0_13] : memref<32x32xf32, #tpu.memory_space<vmem>>, vector<32x32xf32>
    %cst_14 = arith.constant dense<0.000000e+00> : vector<32x128xf32>
    %16 = tpu.matmul %15, %14, %cst_14 {dimension_numbers = #tpu.dot_dimension_numbers<[1], [0], [0], [1], [0, 0, 1, 1], [], []>} : vector<32x32xf32>, vector<32x128xf32>, vector<32x128xf32> -> vector<32x128xf32>
    %c0_15 = arith.constant 0 : index
    %c0_16 = arith.constant 0 : index
    %17 = vector.load %arg7[%c0_15, %c0_16] : memref<32x1xf32, #tpu.memory_space<vmem>>, vector<32x1xf32>
    %18 = vector.broadcast %17 : vector<32x1xf32> to vector<32x128xf32>
    %19 = arith.addf %16, %18 : vector<32x128xf32>
    %cst_17 = arith.constant 0.000000e+00 : f32
    %20 = vector.broadcast %cst_17 : f32 to vector<32x128xf32>
    %21 = arith.maximumf %19, %20 : vector<32x128xf32>
    %c0_18 = arith.constant 0 : index
    %c0_19 = arith.constant 0 : index
    %22 = vector.load %arg8[%c0_18, %c0_19] : memref<1x32xf32, #tpu.memory_space<vmem>>, vector<1x32xf32>
    %cst_20 = arith.constant dense<0.000000e+00> : vector<1x128xf32>
    %23 = tpu.matmul %22, %21, %cst_20 {dimension_numbers = #tpu.dot_dimension_numbers<[1], [0], [0], [1], [0, 0, 1, 1], [], []>} : vector<1x32xf32>, vector<32x128xf32>, vector<1x128xf32> -> vector<1x128xf32>
    %c0_21 = arith.constant 0 : index
    %c0_22 = arith.constant 0 : index
    %24 = vector.load %arg9[%c0_21, %c0_22] : memref<1x1xf32, #tpu.memory_space<vmem>>, vector<1x1xf32>
    %25 = vector.broadcast %24 : vector<1x1xf32> to vector<1x128xf32>
    %26 = arith.addf %23, %25 : vector<1x128xf32>
    %c0_23 = arith.constant 0 : index
    %c0_24 = arith.constant 0 : index
    %27 = vector.load %arg10[%c0_23, %c0_24] : memref<1x128xf32, #tpu.memory_space<vmem>>, vector<1x128xf32>
    tpu.vector_store %arg10[%c0_23, %c0_24], %26 {strides = array<i32>} : memref<1x128xf32, #tpu.memory_space<vmem>>, vector<1x128xf32>,
    return
  }
  func.func @transform_0(%arg0: i32) -> (i32, i32) {
    %c0_i32 = arith.constant 0 : i32
    %c0_i32_0 = arith.constant 0 : i32
    return %arg0, %c0_i32 : i32, i32
  }
  func.func @transform_1(%arg0: i32) -> (i32, i32) {
    %c0_i32 = arith.constant 0 : i32
    %c0_i32_0 = arith.constant 0 : i32
    %c0_i32_1 = arith.constant 0 : i32
    return %c0_i32, %c0_i32_0 : i32, i32
  }
  func.func @transform_2(%arg0: i32) -> (i32, i32) {
    %c0_i32 = arith.constant 0 : i32
    %c0_i32_0 = arith.constant 0 : i32
    %c0_i32_1 = arith.constant 0 : i32
    return %c0_i32, %c0_i32_0 : i32, i32
  }
  func.func @transform_3(%arg0: i32) -> (i32, i32) {
    %c0_i32 = arith.constant 0 : i32
    %c0_i32_0 = arith.constant 0 : i32
    %c0_i32_1 = arith.constant 0 : i32
    return %c0_i32, %c0_i32_0 : i32, i32
  }
  func.func @transform_4(%arg0: i32) -> (i32, i32) {
    %c0_i32 = arith.constant 0 : i32
    %c0_i32_0 = arith.constant 0 : i32
    %c0_i32_1 = arith.constant 0 : i32
    return %c0_i32, %c0_i32_0 : i32, i32
  }
  func.func @transform_5(%arg0: i32) -> (i32, i32) {
    %c0_i32 = arith.constant 0 : i32
    %c0_i32_0 = arith.constant 0 : i32
    %c0_i32_1 = arith.constant 0 : i32
    return %c0_i32, %c0_i32_0 : i32, i32
  }
  func.func @transform_6(%arg0: i32) -> (i32, i32) {
    %c0_i32 = arith.constant 0 : i32
    %c0_i32_0 = arith.constant 0 : i32
    %c0_i32_1 = arith.constant 0 : i32
    return %c0_i32, %c0_i32_0 : i32, i32
  }
  func.func @transform_7(%arg0: i32) -> (i32, i32) {
    %c0_i32 = arith.constant 0 : i32
    %c0_i32_0 = arith.constant 0 : i32
    %c0_i32_1 = arith.constant 0 : i32
    return %c0_i32, %c0_i32_0 : i32, i32
  }
  func.func @transform_8(%arg0: i32) -> (i32, i32) {
    %c0_i32 = arith.constant 0 : i32
    %c0_i32_0 = arith.constant 0 : i32
    %c0_i32_1 = arith.constant 0 : i32
    return %c0_i32, %c0_i32_0 : i32, i32
  }
  func.func @transform_9(%arg0: i32) -> (i32, i32) {
    %c0_i32 = arith.constant 0 : i32
    %c0_i32_0 = arith.constant 0 : i32
    return %c0_i32, %arg0 : i32, i32
  }
}

</mosaic_0001>

<bundles_post_ra>
// kernel: value_network_forward.1
= control target key start
LH: loop header
LB: loop body
LE: loop exit
PB: predicated region body
PF: predicated region fallthrough
CT: control target
= control target key end

     0   :  { %s1123_s0 = inlined_call_operand.vmem [shape: f32[256,16], index: 0, kind: input, shape index: {}]   ;;  %s1124_s1 = inlined_call_operand.vmem [shape: f32[32,16], index: 1, kind: input, shape index: {}]   ;;  %s1125_s2 = inlined_call_operand.vmem [shape: f32[32,1], index: 2, kind: input, shape index: {}]   ;;  %s1126_s3 = inlined_call_operand.vmem [shape: f32[32,32], index: 3, kind: input, shape index: {}]   ;;  %s1127_s4 = inlined_call_operand.vmem [shape: f32[32,1], index: 4, kind: input, shape index: {}]   ;;  %s1128_s5 = inlined_call_operand.vmem [shape: f32[32,32], index: 5, kind: input, shape index: {}]   ;;  %s1129_s6 = inlined_call_operand.vmem [shape: f32[32,1], index: 6, kind: input, shape index: {}]   ;;  %s1130_s7 = inlined_call_operand.vmem [shape: f32[1,32], index: 7, kind: input, shape index: {}]   ;;  %s1131_s8 = inlined_call_operand.<no memory space> [shape: f32[1,1], index: 8, kind: input, shape index: {}]   ;;  %s1132_s9 = inlined_call_operand.hbm [shape: f32[1,256], index: 9, kind: output, shape index: {}]  }
   0x1   :  { %v14_v0 = vstv %s1131_s8 }
   0x2   :  { %15 = vst [vmem:[#allocation2] sm:$0x1] %v14_v0 }
   0x3   :  { %16 = vsyncpa [#allocation4], 0 }
   0x4   :  { %18 = vsyncpa [#allocation4 + $0x1], 0  ;;  %s917_s11 = smov 0   ;;  %s919_s12 = smov 0  }
   0x5   :  { %s921_s13 = smov 0   ;;  %s923_s14 = smov 0  }
   0x6 LB: > { %s938_s8 = sadd.s32 4294967295, %s861_s14   ;;  %s719_s15 = sadd.s32 4294967294, %s861_s14   ;;  %s861_s14 = sphi %s923_s14, %s1138_s14   ;;  %s857_s13 = sphi %s921_s13, %s1137_s13   ;;  %s853_s12 = sphi %s919_s12, %s1136_s12   ;;  %s849_s11 = sphi %s917_s11, %s1135_s11  }
   0x7   : > { %s942_s16 = sadd.s32 1, %s861_s14   ;;  %s225_s17 = sadd.s32 1, %s857_s13 }
   0x8   : > { %s222_s18 = ssub.s32 %s861_s14, %s942_s16  ;;  %p235_p0 = scmp.ne.s32.totalorder %s857_s13, %s853_s12 }
   0x9   : > { %p223_p1 = scmp.eq.s32.totalorder %s222_s18, 0  ;;  %p236_p2 = scmp.eq.s32.totalorder %s938_s8, 1 }
   0xa   : > { %p241_p3 = scmp.ne.s32.totalorder %s853_s12, %s849_s11  ;;  %p242_p4 = scmp.eq.s32.totalorder %s719_s15, 1 }
   0xb   : > { %s953_s19 = scalar_select %p223_p1, %s857_s13, %s225_s17  }
   0xc   : > { %p955_p5 = por %p236_p2, %p235_p0  ;;  %p959_p6 = por %p242_p4, %p241_p3 }
   0xd   : > { %p722_p7 = scmp.ge.s32.totalorder %s861_s14, 1  ;;  %p293_p8 = scmp.lt.s32.totalorder %s861_s14, 3 }
   0xf   : > { %p294_p9 = pnand %p722_p7, %p293_p8 }
  0x10   : > { %s723_s22 = sshll.u32 (!%p294_p9), %s938_s8, 4  ;;  %s326_s25 = sand.u32 (!%p294_p9), 1, %s853_s12  }
  0x11   : > { %297 = sbr.rel (%p294_p9) target bundleno = 715 (0x2cb), region = 56  ;;  %p329_p10 = scmp.lt.s32.totalorder (!%p294_p9), %s723_s22, 31 }
  0x12   : > { %s660_s29 = scalar_lea.hbm (!%p294_p9), %s1132_s9, %s938_s8  ;;  %s327_s30 = scalar_lea.vmem (!%p294_p9), [#allocation3], %s326_s25 }
  0x13   : > { %s662_s10 = sshll.u32 (!%p294_p9), %s327_s30, 4  ;;  %s664_s15 = sshll.u32 (!%p294_p9), %s660_s29, 4  ;;  %s663_s10 = int_to_ptr.vmem [resolvable:$true] %s662_s10  ;;  %s665_s15 = int_to_ptr.hbm [resolvable:$true] %s664_s15 }
  0x14   : > { %s652_s17 = scalar_lea.sflag (!%p294_p9), [#allocation4], %s326_s25  ;;  %s813_s18 = sshra.s32 (!%p294_p9), %s665_s15, 4  ;;  %s814_s18 = int_to_ptr.hbm [resolvable:$true] %s813_s18 }
  0x15   : > { %p820_p0 = scmp.lt.s32.totalorder (!%p294_p9), %s814_s18, %s1132_s9 }
  0x16   : > { %s1140_s22 = smov (!%p329_p10, %s723_s22), 31  ;;  %vm378_vm0 = vcmask 130048   ;;  %v357_v8 = vld [vmem:[%s1125_s2 + $0x18] sm:$0xff]  ;;  %v863_v10 = vmov 0   ;;  %v355_v12 = vld [vmem:[%s1125_s2 + $0x8] sm:$0xff]  ;;  %v356_v13 = vld [vmem:[%s1125_s2 + $0x10] sm:$0xff] }
  0x17   : > { %s724_s23 = sshll.u32 %s1140_s22, 3  ;;  %796 = vset.pattern.permute.xlu0 %v863_v10  ;;  %797 = vset.pattern.permute.xlu1 %v863_v10  ;;  %v354_v16 = vld [vmem:[%s1125_s2] sm:$0xff]  ;;  %v477_v17 = vld [vmem:[%s1127_s4 + $0x8] sm:$0xff]  ;;  %v552_v20 = vld [vmem:[%s1129_s6 + $0x10] sm:$0xff]  ;;  %vm500_vm1 = vcmask 261120  }
  0x18   : > { %s969_s26 = scalar_lea.vmem %s1123_s0, %s724_s23  ;;  %375 = vperm.xlu0 %796, %v357_v8   ;;  %798 = vset.pattern.permute.xlu2 %v863_v10  ;;  %v476_v23 = vld [vmem:[%s1127_s4] sm:$0xff]  ;;  %v551_v27 = vld [vmem:[%s1129_s6 + $0x8] sm:$0xff]  ;;  %v352_v29 = vld [vmem:[%s1124_s1 + $0x10] sm:$0xff]  ;;  %s819_s23 = scalar_lea.hbm %s1132_s9, 2 }
  0x19   : > { %v349_v1 = vld [vmem:[%s969_s26 + $0x78] sm:$0xff]  ;;  %v348_v2 = vld [vmem:[%s969_s26 + $0x70] sm:$0xff]  ;;  %v347_v3 = vld [vmem:[%s969_s26 + $0x68] sm:$0xff]  ;;  %365 = vperm.xlu1 %797, %v355_v12  }
  0x1a   : > { %725 = vmatpush.xpose.msk.msra.mxu0 %vm378_vm0, %v349_v1  ;;  %v346_v4 = vld [vmem:[%s969_s26 + $0x60] sm:$0xff]  ;;  %v345_v5 = vld [vmem:[%s969_s26 + $0x58] sm:$0xff]  ;;  %v344_v6 = vld [vmem:[%s969_s26 + $0x50] sm:$0xff] }
  0x1b   : > { %v343_v7 = vld [vmem:[%s969_s26 + $0x48] sm:$0xff]  ;;  %v342_v9 = vld [vmem:[%s969_s26 + $0x40] sm:$0xff]  ;;  %v341_v11 = vld [vmem:[%s969_s26 + $0x38] sm:$0xff] }
  0x1c   : > { %v340_v14 = vld [vmem:[%s969_s26 + $0x30] sm:$0xff]  ;;  %v339_v15 = vld [vmem:[%s969_s26 + $0x28] sm:$0xff]  ;;  %v338_v18 = vld [vmem:[%s969_s26 + $0x20] sm:$0xff] }
  0x1d   : > { %v337_v19 = vld [vmem:[%s969_s26 + $0x18] sm:$0xff]  ;;  %v336_v21 = vld [vmem:[%s969_s26 + $0x10] sm:$0xff]  ;;  %v335_v22 = vld [vmem:[%s969_s26 + $0x8] sm:$0xff] }
  0x1e   : > { %726 = vmatpush.xpose.msk.msra.mxu0 %vm378_vm0, %v348_v2  ;;  %v620_v24 = vld [vmem:[#allocation2] sm:$0x1]  ;;  %v351_v28 = vld [vmem:[%s1124_s1 + $0x8] sm:$0xff]  ;;  %v353_v30 = vld [vmem:[%s1124_s1 + $0x18] sm:$0xff] }
  0x1f   : > { %v334_v25 = vld [vmem:[%s969_s26] sm:$0xff]  ;;  %v479_v43 = vld [vmem:[%s1127_s4 + $0x18] sm:$0xff]  ;;  %v478_v49 = vld [vmem:[%s1127_s4 + $0x10] sm:$0xff]  ;;  %s815_s26 = scalar_lea.hbm %s814_s18, 1 }
  0x20   : > { %370 = vperm.xlu0 %796, %v356_v13   ;;  %v350_v26 = vld [vmem:[%s1124_s1] sm:$0xff]  ;;  %497 = vperm.xlu2 %798, %v479_v43   ;;  %v473_v50 = vld [vmem:[%s1126_s3 + $0x8] sm:$0xff]  ;;  %v553_v51 = vld [vmem:[%s1129_s6 + $0x18] sm:$0xff]  ;;  %p816_p11 = scmp.ne.s32.totalorder %s814_s18, %s815_s26  ;;  %p821_p1 = scmp.lt.s32.totalorder %s819_s23, %s815_s26 }
  0x21   : > { %360 = vperm.xlu1 %797, %v354_v16   ;;  %v472_v48 = vld [vmem:[%s1126_s3] sm:$0xff]  ;;  %v474_v52 = vld [vmem:[%s1126_s3 + $0x10] sm:$0xff]  ;;  %v475_v54 = vld [vmem:[%s1126_s3 + $0x18] sm:$0xff] }
  0x22   : > { %727 = vmatpush.xpose.msk.msra.mxu0 %vm378_vm0, %v347_v3  ;;  %v550_v53 = vld [vmem:[%s1129_s6] sm:$0xff]  ;;  %v547_v8 = vld [vmem:[%s1128_s5 + $0x8] sm:$0xff]  ;;  %v549_v10 = vld [vmem:[%s1128_s5 + $0x18] sm:$0xff]  ;;  %p817_p12 = pnand %p816_p11, %p955_p5  ;;  %p822_p2 = por %p821_p1, %p820_p0 }
  0x24   : > { %p818_p13 = pneg %p817_p12 }
  0x26   : > { %728 = vmatpush.xpose.msk.msra.mxu0 %vm378_vm0, %v346_v4  ;;  %p823_p3 = pnand %p822_p2, %p818_p13 }
  0x28   : > { %487 = vperm.xlu0 %796, %v477_v17   ;;  %492 = vperm.xlu2 %798, %v478_v49  }
  0x29   : > { %482 = vperm.xlu1 %797, %v476_v23  }
  0x2a   : > { %729 = vmatpush.xpose.msk.msra.mxu0 %vm378_vm0, %v345_v5 }
  0x2e   : > { %730 = vmatpush.xpose.msk.msra.mxu0 %vm378_vm0, %v344_v6 }
  0x30   : > { %566 = vperm.xlu0 %796, %v552_v20   ;;  %571 = vperm.xlu2 %798, %v553_v51  }
  0x31   : > { %561 = vperm.xlu1 %797, %v551_v27   ;;  %v619_v27 = vld [vmem:[%s1130_s7] sm:$0x1] }
  0x32   : > { %731 = vmatpush.xpose.msk.msra.mxu0 %vm378_vm0, %v343_v7  ;;  %v546_v7 = vld [vmem:[%s1128_s5] sm:$0xff] }
  0x36   : > { %732 = vmatpush.xpose.msk.msra.mxu0 %vm378_vm0, %v342_v9  ;;  %v548_v9 = vld [vmem:[%s1128_s5 + $0x10] sm:$0xff] }
  0x38   : > { %623 = vperm.xlu0 %796, %v620_v24   ;;  %556 = vperm.xlu2 %798, %v550_v53  }
  0x3a   : > { %733 = vmatpush.xpose.msk.msra.mxu0 %vm378_vm0, %v341_v11 }
  0x3e   : > { %734 = vmatpush.xpose.msk.msra.mxu0 %vm378_vm0, %v340_v14 }
  0x42   : > { %735 = vmatpush.xpose.msk.msra.mxu0 %vm378_vm0, %v339_v15 }
  0x46   : > { %736 = vmatpush.xpose.msk.msra.mxu0 %vm378_vm0, %v338_v18 }
  0x4a   : > { %737 = vmatpush.xpose.msk.msra.mxu0 %vm378_vm0, %v337_v19 }
  0x4e   : > { %738 = vmatpush.xpose.msk.msra.mxu0 %vm378_vm0, %v336_v21 }
  0x52   : > { %739 = vmatpush.xpose.msk.msra.mxu0 %vm378_vm0, %v335_v22 }
  0x56   : > { %740 = vmatpush.xpose.msk.msra.mxu0 %vm378_vm0, %v334_v25 }
  0x59   : > { %741 = vmatmul.msk.f32.vlgmr.msra.gmra.mxu0 %vm378_vm0, %v350_v26 }
  0x61   : > { %742 = vmatmul.msk.f32.gmra.mxu0 %vm378_vm0, %v351_v28 }
  0x69   : > { %743 = vmatmul.msk.f32.gmra.mxu0 %vm378_vm0, %v352_v29 }
  0x71   : > { %744 = vmatmul.msk.f32.gmra.mxu0 %vm378_vm0, %v353_v30 }
  0x7a   : > { %v498_v57 = vpop.permute.xlu2 %497 }
  0x82   : > { %v493_v59 = vpop.permute.xlu2 %492 }
  0x8a   : > { %v376_v33 = vpop.permute.xlu0 %375  ;;  %v572_v14 = vpop.permute.xlu2 %571 }
  0x8b   : > { %v366_v34 = vpop.permute.xlu1 %365 }
  0x92   : > { %v371_v36 = vpop.permute.xlu0 %370  ;;  %v557_v22 = vpop.permute.xlu2 %556 }
  0x93   : > { %v361_v40 = vpop.permute.xlu1 %360 }
  0x9a   : > { %v488_v63 = vpop.permute.xlu0 %487 }
  0x9b   : > { %v483_v2 = vpop.permute.xlu1 %482 }
  0xa2   : > { %v567_v15 = vpop.permute.xlu0 %566 }
  0xa3   : > { %v562_v19 = vpop.permute.xlu1 %561 }
  0xaa   : > { %v624_v28 = vpop.permute.xlu0 %623 }
  0xab   : > { %v626_v29 = vperm.slane %v624_v28, 0 }
  0xd6   : > { %v456_v31 = vpop.f32.mrf.mxu0 }
  0xd7   : > { %v457_v44 = vadd.f32 %v456_v31, %v361_v40 }
  0xd9   : > { %v468_v47 = vmax.f32 %v457_v44, 0.0 }
  0xde   : > { %v459_v32 = vpop.f32.mrf.mxu0 }
  0xdf   : > { %v460_v41 = vadd.f32 %v459_v32, %v366_v34 }
  0xe1   : > { %v469_v46 = vmax.f32 %v460_v41, 0.0 }
  0xe6   : > { %v462_v35 = vpop.f32.mrf.mxu0 }
  0xe7   : > { %v463_v38 = vadd.f32 %v462_v35, %v371_v36 }
  0xe9   : > { %v470_v45 = vmax.f32 %v463_v38, 0.0 }
  0xee   : > { %v465_v37 = vpop.f32.mrf.mxu0 }
  0xef   : > { %v466_v39 = vadd.f32 %v465_v37, %v376_v33 }
  0xf1   : > { %v471_v42 = vmax.f32 %v466_v39, 0.0 }
  0xf3   : > { %525 = vmatpush.msra.mxu1 %v471_v42 }
  0xf5   : > { %526 = vmatpush.msra.mxu1 %v470_v45 }
  0xf7   : > { %527 = vmatpush.msra.mxu1 %v469_v46 }
  0xf9   : > { %528 = vmatpush.msra.mxu1 %v468_v47 }
  0xfa   : > { %745 = vmatmul.msk.f32.vlgmr.msra.gmra.mxu1 %vm500_vm1, %v472_v48 }
 0x102   : > { %746 = vmatmul.msk.f32.gmra.mxu1 %vm500_vm1, %v473_v50 }
 0x10a   : > { %747 = vmatmul.msk.f32.gmra.mxu1 %vm500_vm1, %v474_v52 }
 0x112   : > { %748 = vmatmul.msk.f32.gmra.mxu1 %vm500_vm1, %v475_v54 }
 0x177   : > { %v530_v55 = vpop.f32.mrf.mxu1 }
 0x178   : > { %v531_v3 = vadd.f32 %v530_v55, %v483_v2 }
 0x17a   : > { %v542_v6 = vmax.f32 %v531_v3, 0.0 }
 0x17f   : > { %v533_v56 = vpop.f32.mrf.mxu1 }
 0x180   : > { %v534_v0 = vadd.f32 %v533_v56, %v488_v63 }
 0x182   : > { %v543_v5 = vmax.f32 %v534_v0, 0.0 }
 0x187   : > { %v536_v58 = vpop.f32.mrf.mxu1 }
 0x188   : > { %v537_v61 = vadd.f32 %v536_v58, %v493_v59 }
 0x18a   : > { %v544_v4 = vmax.f32 %v537_v61, 0.0 }
 0x18f   : > { %v539_v60 = vpop.f32.mrf.mxu1 }
 0x190   : > { %v540_v62 = vadd.f32 %v539_v60, %v498_v57 }
 0x192   : > { %v545_v1 = vmax.f32 %v540_v62, 0.0 }
 0x194   : > { %598 = vmatpush.msra.mxu2 %v545_v1 }
 0x196   : > { %599 = vmatpush.msra.mxu2 %v544_v4 }
 0x198   : > { %600 = vmatpush.msra.mxu2 %v543_v5 }
 0x19a   : > { %601 = vmatpush.msra.mxu2 %v542_v6 }
 0x19b   : > { %749 = vmatmul.msk.f32.vlgmr.msra.gmra.mxu2 %vm500_vm1, %v546_v7 }
 0x1a3   : > { %750 = vmatmul.msk.f32.gmra.mxu2 %vm500_vm1, %v547_v8 }
 0x1ab   : > { %751 = vmatmul.msk.f32.gmra.mxu2 %vm500_vm1, %v548_v9 }
 0x1b3   : > { %752 = vmatmul.msk.f32.gmra.mxu2 %vm500_vm1, %v549_v10 }
 0x21e   : > { %v603_v11 = vpop.f32.mrf.mxu2 }
 0x21f   : > { %v604_v23 = vadd.f32 %v603_v11, %v557_v22 }
 0x221   : > { %v615_v26 = vmax.f32 %v604_v23, 0.0 }
 0x226   : > { %v606_v12 = vpop.f32.mrf.mxu2 }
 0x227   : > { %v607_v20 = vadd.f32 %v606_v12, %v562_v19 }
 0x229   : > { %v616_v25 = vmax.f32 %v607_v20, 0.0 }
 0x22e   : > { %v609_v13 = vpop.f32.mrf.mxu2 }
 0x22f   : > { %v610_v17 = vadd.f32 %v609_v13, %v567_v15 }
 0x231   : > { %v617_v24 = vmax.f32 %v610_v17, 0.0 }
 0x236   : > { %v612_v16 = vpop.f32.mrf.mxu2 }
 0x237   : > { %v613_v18 = vadd.f32 %v612_v16, %v572_v14 }
 0x239   : > { %v618_v21 = vmax.f32 %v613_v18, 0.0 }
 0x23b   : > { %642 = vmatpush.msra.mxu3 %v618_v21 }
 0x23d   : > { %643 = vmatpush.msra.mxu3 %v617_v24 }
 0x23f   : > { %644 = vmatpush.msra.mxu3 %v616_v25 }
 0x241   : > { %645 = vmatpush.msra.mxu3 %v615_v26 }
 0x242   : > { %753 = vmatmul.msk.f32.vlgmr.msra.gmra.mxu3 %vm500_vm1, %v619_v27 }
 0x2c5   : > { %v647_v30 = vpop.f32.mrf.mxu3 }
 0x2c6   : > { %v648_v31 = vadd.f32 %v647_v30, %v626_v29 }
 0x2c8   : > { %650 = vst [vmem:[%s327_s30] sm:$0x1] %v648_v31 }
 0x2c9   : > { %826 = shalt.err (!%p823_p3)
}
 0x2ca   : > { %756 = dma.vmem_to_hbm [thread:$0]  (%p955_p5), %s663_s10, 16, %s665_s15, %s652_s17  }
 0x2cb PF: > { %p762_p4 = scmp.ge.s32.totalorder %s861_s14, 2  ;;  %s676_s25 = sand.u32 1, %s849_s11  }
 0x2cc   : > { %s677_s28 = scalar_lea.sflag [#allocation4], %s676_s25 }
 0x2cd   : > { %p759_p7 = pnand %p762_p4, %p959_p6 }
 0x2cf   : > { %p760_p8 = pneg %p759_p7 }
 0x2d1   : > { %844 = dma.done.wait (%p760_p8), %s677_s28, 16  }
 0x2d2   : > { %846 = vsyncadd (%p760_p8), %s677_s28, 4294967280  ;;  %p21_p9 = scmp.ge.s32.totalorder %s942_s16, 4   ;;  %s1135_s11 = smov %s853_s12 }
 0x2d3   : > { %s1136_s12 = smov %s857_s13  ;;  %s1137_s13 = smov %s953_s19 }
 0x2d4   : > { %s1138_s14 = smov %s942_s16  ;;  %23 = sbr.rel (!%p21_p9) target bundleno = 6 (0x6), region = 91 }
 0x2d9   :  { %682 = vsyncpa [#allocation4], 1 }
 0x2da   :  { %684 = vsyncpa [#allocation4 + $0x1], 1 }

</bundles_post_ra>
